<compile_context>
chip_gen: v5e
topology: v5e:2x2
jax: 0.10.0
libtpu: 0.0.40
codegen_flags: <defaults>
</compile_context>

<pallas_src>
import functools

import jax
import jax.numpy as jnp
import numpy as np
from jax.experimental import pallas as pl
from jax.experimental.pallas import tpu as pltpu

_LOG_2PI = 1.8378770664093453
_SQRT_HALF = 0.7071067811865476


# ----------------------------------------------------------------------------- kernel
def _fused_gmm_kernel(out_ref, grid_ref, bgt_ref, truth_ref, mask_ref, res_ref,
                      m_sc, l_sc, psum_sc, pvar_sc, sqerr_sc,
                      *, K, tk, needs_mask):
    """Fused per-batch GMM loss statistics.

    Block shapes (per grid step (b, k)):
      out_ref   : (1, C, tk)  raw NCHW network channels, K tile on the lane axis
      grid_ref  : (2, tk)     pixel-center coordinates (gy, gx) for this K tile
      bgt_ref   : (1, 1, tk)  background truth, flattened to K
      truth_ref : (1, M, 3)   ground-truth points (resident across K tiles)
      mask_ref  : (1, M, 1)   per-point mask       (resident across K tiles)
      res_ref   : (1, 1, 4)   [sum(-lse*mask), sum(p), sum(p - p^2), SSE(bg)]
    Scratch:
      m_sc, l_sc                 : (M, 1) online-logsumexp running max / sum-of-exp
      psum_sc, pvar_sc, sqerr_sc : (1, 1) scalar accumulators
    """
    k = pl.program_id(1)

    @pl.when(k == 0)
    def _init():
        # finite sentinel (not -inf) so exp(m_sc - m_new) can never be NaN
        m_sc[...] = jnp.full_like(m_sc, -1e30)
        l_sc[...] = jnp.zeros_like(l_sc)
        psum_sc[...] = jnp.zeros_like(psum_sc)
        pvar_sc[...] = jnp.zeros_like(pvar_sc)
        sqerr_sc[...] = jnp.zeros_like(sqerr_sc)

    ch = out_ref[0]                                     # (C, tk) raw channels
    g = grid_ref[...]                                   # (2, tk) grid coords

    # --- reconstruct GMM parameters from raw channels (per-K work, O(tk)) ---
    p = ch[0:1, :]                                      # (1, tk) mixture weights
    bg = ch[9:10, :]                                    # (1, tk) background map
    mu0 = ch[2:3, :] + g[0:1, :]                        # y-offset + pixel y
    mu1 = ch[3:4, :] + g[1:2, :]                        # x-offset + pixel x
    mu2 = ch[4:5, :] + 0.01                             # N channel
    sig0 = ch[5:6, :]
    sig1 = ch[6:7, :]
    sig2 = ch[7:8, :]

    d_bg = bg - bgt_ref[0]

    if needs_mask:
        lane = jax.lax.broadcasted_iota(jnp.int32, (1, tk), 1)
        valid = (k * tk + lane) < K                     # (1, tk) tail-tile mask
        p = jnp.where(valid, p, 0.0)
        d_bg = jnp.where(valid, d_bg, 0.0)
        mu0 = jnp.where(valid, mu0, 0.0)
        mu1 = jnp.where(valid, mu1, 0.0)
        mu2 = jnp.where(valid, mu2, 0.0)
        sig0 = jnp.where(valid, sig0, 1.0)
        sig1 = jnp.where(valid, sig1, 1.0)
        sig2 = jnp.where(valid, sig2, 1.0)

    # --- count-loss / background statistics on this K tile ---
    psum_sc[...] += jnp.sum(p, axis=(0, 1), keepdims=True)
    pvar_sc[...] += jnp.sum(p - p * p, axis=(0, 1), keepdims=True)
    sqerr_sc[...] += jnp.sum(d_bg * d_bg, axis=(0, 1), keepdims=True)

    # --- per-K hoisted constants: sqrt(0.5)/sigma folds the 0.5 of the quadratic ---
    c0 = _SQRT_HALF / sig0                              # 3*tk EUP reciprocals
    c1 = _SQRT_HALF / sig1
    c2 = _SQRT_HALF / sig2
    lp0 = (jnp.log(jnp.maximum(p, 1e-37))               # clamp: avoid log(0) -> -inf
           - (jnp.log(sig0) + jnp.log(sig1) + jnp.log(sig2))
           - 1.5 * _LOG_2PI)                            # (1, tk)
    if needs_mask:
        lp0 = jnp.where(valid, lp0, -1e30)

    # --- (M, tk) quadratic form: 12 VALU ops / element ---
    t = truth_ref[0]                                    # (M, 3)
    z0 = (t[:, 0:1] - mu0) * c0                         # (M, tk)
    z1 = (t[:, 1:2] - mu1) * c1
    z2 = (t[:, 2:3] - mu2) * c2
    lp = lp0 - z0 * z0 - z1 * z1 - z2 * z2              # (M, tk)

    # --- online logsumexp over the K axis ---
    m_tile = jnp.max(lp, axis=-1, keepdims=True)        # (M, 1)
    m_new = jnp.maximum(m_sc[...], m_tile)
    alpha = jnp.exp(m_sc[...] - m_new)
    l_sc[...] = alpha * l_sc[...] + jnp.sum(jnp.exp(lp - m_new), axis=-1, keepdims=True)
    m_sc[...] = m_new

    @pl.when(k == pl.num_programs(1) - 1)
    def _finalize():
        psum = psum_sc[...]                             # (1, 1)
        # mixture normalization (log weights were left unnormalized above)
        lse = m_sc[...] + jnp.log(l_sc[...]) - jnp.log(psum)           # (M, 1)
        gmm = jnp.sum(-lse * mask_ref[0], axis=(0, 1), keepdims=True)  # (1, 1)
        res_ref[0] = jnp.concatenate(
            [gmm, psum, pvar_sc[...], sqerr_sc[...]], axis=-1)         # single (1, 4) store


# ----------------------------------------------------------------------------- tiling
def _tpu_vmem_capacity():
    try:
        info = pltpu.get_tpu_info()
        cap = getattr(info, "vmem_capacity_bytes", None)
        if cap:
            return int(cap)
    except Exception:
        pass
    return 64 << 20          # conservative default (v7x per-core VMEM)


def _vmem_limit_bytes():
    cap = _tpu_vmem_capacity()
    return int(min(cap * 3 // 4, 96 << 20))


def _choose_tiling(K, M, C, tile_override=None):
    """Pick the K-tile size.

    tk is a multiple of 128 (or the full K), sized so that ~4 live (M, tk) f32
    temporaries plus the double-buffered (C + grid + bg) inputs fit a
    generation-aware VMEM budget (v5e/v6e: ~24 MiB; v7x: ~12 MiB).  The grid is
    cdiv(K, tk); a possible tail tile is masked in-kernel.
    """
    if tile_override is not None:
        tk = min(int(tile_override), K)
        if tk < K and tk % 128 != 0:
            tk = max(128, (tk // 128) * 128)
        return tk, -(-K // tk)

    cap = _tpu_vmem_capacity()
    budget = max(2 << 20, min(cap // 5, 24 << 20))

    def tile_bytes(t):
        work = 4 * 4 * M * t                 # ~4 live (M, t) f32 temporaries
        dma = 2 * 2 * (C + 3) * t * 4        # double-buffered (C, t)+(2, t)+(1, t)
        return work + dma

    if tile_bytes(K) <= budget:
        return K, 1
    tk = 128
    t = 256
    while t <= K and tile_bytes(t) <= budget:
        tk = t
        t += 128
    return tk, -(-K // tk)


# ----------------------------------------------------------------------------- module
class GMMLossDecodePallas:
    """JAX/Pallas re-implementation of the PyTorch GMMLossDecode module."""

    def __init__(self, size, multiplier=(1.0, 1.0, 1.0), tile_k=None):
        H, W = int(size[0]), int(size[1])
        gy, gx = jnp.meshgrid(jnp.arange(H, dtype=jnp.float32) + 0.5,
                              jnp.arange(W, dtype=jnp.float32) + 0.5,
                              indexing="ij")
        self.grid = jnp.stack([gy, gx], 0)                 # (2, H, W), torch 'ij' order
        self.grid_flat = self.grid.reshape(2, H * W)       # (2, K) kernel-side constant
        self.size = (H, W)
        self.multiplier = multiplier
        self.tile_k = tile_k

    def __call__(self, output, pos, mask, bg_truth, seperate=False):
        # TODO(synk): torch.cuda.synchronize() has no TPU equivalent (handled by
        #             jax.block_until_ready at the call site).
        B, C, H, W = output.shape
        K = H * W

        out_flat = output.reshape(B, C, K).astype(jnp.float32)      # pure reshape, no copy
        bgt = bg_truth.reshape(B, 1, K).astype(jnp.float32)
        truth = pos.reshape(B, -1, 3).astype(jnp.float32)
        # torch: truth[:, :, 2] /= truth[:, :, 2].max()  (global max; div-by-zero hazard
        # exists in the PyTorch original too, kept faithful)
        truth = truth.at[:, :, 2].set(truth[:, :, 2] / jnp.max(truth[:, :, 2]))
        M = truth.shape[1]
        mask3 = mask.reshape(B, M, 1).astype(jnp.float32)

        tk, kt = _choose_tiling(K, M, C, self.tile_k)
        needs_mask = (kt * tk != K)
        vmem_limit = _vmem_limit_bytes()

        cost = pl.CostEstimate(
            flops=int(B * kt * (12 * M * tk + 16 * tk)),
            transcendentals=int(B * kt * (M * tk + 7 * tk)),
            bytes_accessed=int(4 * (B * ((C + 1) * K + 4 * M + 4) + 2 * K)),
        )

        kern = functools.partial(_fused_gmm_kernel, K=K, tk=tk, needs_mask=needs_mask)

        stats = pl.pallas_call(
            kern,
            out_shape=jax.ShapeDtypeStruct((B, 1, 4), jnp.float32),
            grid_spec=pltpu.PrefetchScalarGridSpec(
                num_scalar_prefetch=0,
                grid=(B, kt),
                in_specs=[
                    pl.BlockSpec((1, C, tk), lambda b, k: (b, 0, k)),   # raw channels
                    pl.BlockSpec((2, tk), lambda b, k: (0, k)),         # grid constant
                    pl.BlockSpec((1, 1, tk), lambda b, k: (b, 0, k)),   # bg truth
                    pl.BlockSpec((1, M, 3), lambda b, k: (b, 0, 0)),    # truth (resident)
                    pl.BlockSpec((1, M, 1), lambda b, k: (b, 0, 0)),    # mask  (resident)
                ],
                out_specs=pl.BlockSpec((1, 1, 4), lambda b, k: (b, 0, 0)),
                scratch_shapes=[
                    pltpu.VMEM((M, 1), jnp.float32),   # running max
                    pltpu.VMEM((M, 1), jnp.float32),   # running sum-of-exp
                    pltpu.VMEM((1, 1), jnp.float32),   # sum(prob)
                    pltpu.VMEM((1, 1), jnp.float32),   # sum(prob - prob^2)
                    pltpu.VMEM((1, 1), jnp.float32),   # SSE(bg, bg_truth)
                ]),
            compiler_params=pltpu.CompilerParams(
                dimension_semantics=("parallel", "arbitrary"),
                vmem_limit_bytes=vmem_limit),
            cost_estimate=cost,
        )(out_flat, self.grid_flat, bgt, truth, mask3)

        gmm_loss = jnp.sum(stats[:, 0, 0])
        p_mean = stats[:, 0, 1]                      # (B,)  sum(prob)
        p_var = stats[:, 0, 2]                       # (B,)  sum(prob - prob^2)
        sqerr = stats[:, 0, 3]                       # (B,)  SSE(bg)

        # count loss: Normal(p_mean, sqrt(p_var)).log_prob(n)
        n = jnp.sum(mask, axis=-1)
        log_prob_n = (-0.5 * (n - p_mean) ** 2 / p_var
                      - 0.5 * jnp.log(p_var) - 0.5 * _LOG_2PI)
        c_loss = jnp.sum(-log_prob_n * n) / 10.0

        # background MSE * 10
        bg_loss = jnp.sum(sqerr) / (B * K) * 10.0

        if seperate:
            return jnp.stack([gmm_loss, c_loss, bg_loss])
        return (self.multiplier[0] * gmm_loss
                + self.multiplier[1] * c_loss
                + self.multiplier[2] * bg_loss)


# ----------------------------------------------------------------------------- pure-JAX reference
def reference_loss(output, pos, mask, bg_truth, grid, seperate=False,
                   multiplier=(1.0, 1.0, 1.0)):
    B, C, H, W = output.shape
    K = H * W
    prob = output[:, 0].reshape(B, K)
    p_xy = jnp.transpose(output[:, 2:4] + grid[None], (0, 2, 3, 1)).reshape(B, K, 2)
    N = jnp.transpose(output[:, 4:5], (0, 2, 3, 1)).reshape(B, K, 1) + 0.01
    N_sig = jnp.transpose(output[:, 7:8], (0, 2, 3, 1)).reshape(B, K, 1)
    p_sig = jnp.transpose(output[:, 5:7], (0, 2, 3, 1)).reshape(B, K, 2)
    bg = output[:, 9]
    mu = jnp.concatenate([p_xy, N], -1)                              # (B, K, 3)
    sig = jnp.concatenate([p_sig, N_sig], -1)                        # (B, K, 3)

    p_mean = jnp.sum(prob, -1)
    p_var = jnp.sum(prob - prob ** 2, -1)

    truth = pos.reshape(B, -1, 3)
    truth = truth.at[:, :, 2].set(truth[:, :, 2] / jnp.max(truth[:, :, 2]))

    log_mix = jnp.log(prob) - jnp.log(p_mean)[:, None]               # (B, K)
    z = (truth[:, :, None, :] - mu[:, None, :, :]) / sig[:, None, :, :]      # (B, M, K, 3)
    log_comp = jnp.sum(-0.5 * z ** 2 - jnp.log(sig[:, None, :, :])
                       - 0.5 * _LOG_2PI, axis=-1)                    # (B, M, K)
    lse = jax.scipy.special.logsumexp(log_comp + log_mix[:, None, :], axis=-1)
    gmm_loss = jnp.sum(-lse * mask)

    n = jnp.sum(mask, -1)
    log_prob_n = -0.5 * (n - p_mean) ** 2 / p_var - 0.5 * jnp.log(p_var) - 0.5 * _LOG_2PI
    c_loss = jnp.sum(-log_prob_n * n) / 10.0
    bg_loss = jnp.mean((bg - bg_truth) ** 2) * 10.0

    if seperate:
        return jnp.stack([gmm_loss, c_loss, bg_loss])
    return (multiplier[0] * gmm_loss + multiplier[1] * c_loss + multiplier[2] * bg_loss)


# ----------------------------------------------------------------------------- main
if __name__ == "__main__":
    def make_inputs(key, B, C, H, W, M):
        k1, k2, k3, k4 = jax.random.split(key, 4)
        base = jax.random.normal(k1, (B, C, H, W), jnp.float32)
        # make the channels the loss interprets as probabilities / scales valid:
        output = base.at[:, 0].set(jax.nn.sigmoid(base[:, 0]))              # prob in (0, 1)
        output = output.at[:, 5:8].set(jax.nn.softplus(base[:, 5:8]) + 0.1)  # sigmas > 0
        pos = jax.random.uniform(k2, (B, M, 3), jnp.float32,
                                 minval=0.5, maxval=float(min(H, W)) - 0.5)
        mask = (jax.random.uniform(k3, (B, M)) > 0.3).astype(jnp.float32)
        bg_truth = jax.random.normal(k4, (B, H, W), jnp.float32)
        return output, pos, mask, bg_truth

    # --- test 1: single-tile path (K fits one VMEM tile) ---
    B, C, H, W, M = 2, 10, 16, 16, 8
    output, pos, mask, bg_truth = make_inputs(jax.random.PRNGKey(0), B, C, H, W, M)
    module = GMMLossDecodePallas((H, W), multiplier=(1.0, 1.0, 1.0))
    loss = module(output, pos, mask, bg_truth)
    jax.block_until_ready(loss)
    ref = reference_loss(output, pos, mask, bg_truth, module.grid)
    np.testing.assert_allclose(np.asarray(loss), np.asarray(ref), rtol=1e-3, atol=1e-3)

    parts = module(output, pos, mask, bg_truth, seperate=True)
    jax.block_until_ready(parts)
    ref_parts = reference_loss(output, pos, mask, bg_truth, module.grid, seperate=True)
    np.testing.assert_allclose(np.asarray(parts), np.asarray(ref_parts),
                               rtol=1e-3, atol=1e-3)

    # --- test 2: multi-tile online logsumexp (forced K tiling, divisible) ---
    B, C, H, W, M = 2, 10, 32, 32, 16
    output, pos, mask, bg_truth = make_inputs(jax.random.PRNGKey(1), B, C, H, W, M)
    module2 = GMMLossDecodePallas((H, W), tile_k=512)        # K=1024 -> 2 K tiles
    loss2 = module2(output, pos, mask, bg_truth)
    jax.block_until_ready(loss2)
    ref2 = reference_loss(output, pos, mask, bg_truth, module2.grid)
    np.testing.assert_allclose(np.asarray(loss2), np.asarray(ref2), rtol=1e-3, atol=1e-3)

    # --- test 3: non-divisible K (masked tail tile) ---
    B, C, H, W, M = 2, 10, 16, 20, 8
    output, pos, mask, bg_truth = make_inputs(jax.random.PRNGKey(2), B, C, H, W, M)
    module3 = GMMLossDecodePallas((H, W), tile_k=256)        # K=320 -> 2 tiles, tail masked
    loss3 = module3(output, pos, mask, bg_truth)
    jax.block_until_ready(loss3)
    ref3 = reference_loss(output, pos, mask, bg_truth, module3.grid)
    np.testing.assert_allclose(np.asarray(loss3), np.asarray(ref3), rtol=1e-3, atol=1e-3)

    print("KERNEL_OK")
</pallas_src>

<mosaic_0001>
module attributes {stable_mosaic.version = 11 : i64} {
  func.func @_fused_gmm_kernel(%arg0: i32, %arg1: i32, %arg2: memref<1x10x256xf32, #tpu.memory_space<vmem>>, %arg3: memref<2x256xf32, #tpu.memory_space<vmem>>, %arg4: memref<1x1x256xf32, #tpu.memory_space<vmem>>, %arg5: memref<1x8x3xf32, #tpu.memory_space<vmem>>, %arg6: memref<1x8x1xf32, #tpu.memory_space<vmem>>, %arg7: memref<1x1x4xf32, #tpu.memory_space<vmem>>, %arg8: memref<8x1xf32, #tpu.memory_space<vmem>>, %arg9: memref<8x1xf32, #tpu.memory_space<vmem>>, %arg10: memref<1x1xf32, #tpu.memory_space<vmem>>, %arg11: memref<1x1xf32, #tpu.memory_space<vmem>>, %arg12: memref<1x1xf32, #tpu.memory_space<vmem>>) attributes {dimension_semantics = [#tpu.dimension_semantics<parallel>, #tpu.dimension_semantics<arbitrary>], iteration_bounds = array<i64: 2, 1>, scalar_prefetch = 0 : i64, scratch_operands = 5 : i64, tpu.core_type = #tpu.core_type<tc>, window_params = [{transform_indices = @transform_0, window_bounds = array<i64: 1, 10, 256>}, {transform_indices = @transform_1, window_bounds = array<i64: 2, 256>}, {transform_indices = @transform_2, window_bounds = array<i64: 1, 1, 256>}, {transform_indices = @transform_3, window_bounds = array<i64: 1, 8, 3>}, {transform_indices = @transform_4, window_bounds = array<i64: 1, 8, 1>}, {transform_indices = @transform_5, window_bounds = array<i64: 1, 1, 4>}]} {
    %c0_i32 = arith.constant 0 : i32
    %0 = arith.cmpi eq, %arg1, %c0_i32 : i32
    %1 = arith.extui %0 : i1 to i32
    %c0_i32_0 = arith.constant 0 : i32
    %2 = arith.cmpi ne, %1, %c0_i32_0 : i32
    scf.if %2 {
      %cst_45 = arith.constant -1.000000e+30 : f32
      %114 = vector.broadcast %cst_45 : f32 to vector<8x1xf32>
      %c0_46 = arith.constant 0 : index
      %c0_47 = arith.constant 0 : index
      %115 = vector.load %arg8[%c0_46, %c0_47] : memref<8x1xf32, #tpu.memory_space<vmem>>, vector<8x1xf32>
      tpu.vector_store %arg8[%c0_46, %c0_47], %114 {strides = array<i32>} : memref<8x1xf32, #tpu.memory_space<vmem>>, vector<8x1xf32>,
      %cst_48 = arith.constant 0.000000e+00 : f32
      %116 = vector.broadcast %cst_48 : f32 to vector<8x1xf32>
      %c0_49 = arith.constant 0 : index
      %c0_50 = arith.constant 0 : index
      %117 = vector.load %arg9[%c0_49, %c0_50] : memref<8x1xf32, #tpu.memory_space<vmem>>, vector<8x1xf32>
      tpu.vector_store %arg9[%c0_49, %c0_50], %116 {strides = array<i32>} : memref<8x1xf32, #tpu.memory_space<vmem>>, vector<8x1xf32>,
      %cst_51 = arith.constant 0.000000e+00 : f32
      %118 = vector.broadcast %cst_51 : f32 to vector<1x1xf32>
      %c0_52 = arith.constant 0 : index
      %c0_53 = arith.constant 0 : index
      %119 = vector.load %arg10[%c0_52, %c0_53] : memref<1x1xf32, #tpu.memory_space<vmem>>, vector<1x1xf32>
      tpu.vector_store %arg10[%c0_52, %c0_53], %118 {strides = array<i32>} : memref<1x1xf32, #tpu.memory_space<vmem>>, vector<1x1xf32>,
      %cst_54 = arith.constant 0.000000e+00 : f32
      %120 = vector.broadcast %cst_54 : f32 to vector<1x1xf32>
      %c0_55 = arith.constant 0 : index
      %c0_56 = arith.constant 0 : index
      %121 = vector.load %arg11[%c0_55, %c0_56] : memref<1x1xf32, #tpu.memory_space<vmem>>, vector<1x1xf32>
      tpu.vector_store %arg11[%c0_55, %c0_56], %120 {strides = array<i32>} : memref<1x1xf32, #tpu.memory_space<vmem>>, vector<1x1xf32>,
      %cst_57 = arith.constant 0.000000e+00 : f32
      %122 = vector.broadcast %cst_57 : f32 to vector<1x1xf32>
      %c0_58 = arith.constant 0 : index
      %c0_59 = arith.constant 0 : index
      %123 = vector.load %arg12[%c0_58, %c0_59] : memref<1x1xf32, #tpu.memory_space<vmem>>, vector<1x1xf32>
      tpu.vector_store %arg12[%c0_58, %c0_59], %122 {strides = array<i32>} : memref<1x1xf32, #tpu.memory_space<vmem>>, vector<1x1xf32>,
    } else {
    }
    %c0 = arith.constant 0 : index
    %c0_1 = arith.constant 0 : index
    %c0_2 = arith.constant 0 : index
    %3 = vector.load %arg2[%c0, %c0_1, %c0_2] : memref<1x10x256xf32, #tpu.memory_space<vmem>>, vector<1x10x256xf32>
    %4 = vector.shape_cast %3 : vector<1x10x256xf32> to vector<10x256xf32>
    %c0_3 = arith.constant 0 : index
    %c0_4 = arith.constant 0 : index
    %5 = vector.load %arg3[%c0_3, %c0_4] : memref<2x256xf32, #tpu.memory_space<vmem>>, vector<2x256xf32>
    %6 = vector.extract_strided_slice %4 {offsets = [0, 0], sizes = [1, 256], strides = [1, 1]} : vector<10x256xf32> to vector<1x256xf32>
    %7 = vector.extract_strided_slice %4 {offsets = [9, 0], sizes = [1, 256], strides = [1, 1]} : vector<10x256xf32> to vector<1x256xf32>
    %8 = vector.extract_strided_slice %4 {offsets = [2, 0], sizes = [1, 256], strides = [1, 1]} : vector<10x256xf32> to vector<1x256xf32>
    %9 = vector.extract_strided_slice %5 {offsets = [0, 0], sizes = [1, 256], strides = [1, 1]} : vector<2x256xf32> to vector<1x256xf32>
    %10 = arith.addf %8, %9 : vector<1x256xf32>
    %11 = vector.extract_strided_slice %4 {offsets = [3, 0], sizes = [1, 256], strides = [1, 1]} : vector<10x256xf32> to vector<1x256xf32>
    %12 = vector.extract_strided_slice %5 {offsets = [1, 0], sizes = [1, 256], strides = [1, 1]} : vector<2x256xf32> to vector<1x256xf32>
    %13 = arith.addf %11, %12 : vector<1x256xf32>
    %14 = vector.extract_strided_slice %4 {offsets = [4, 0], sizes = [1, 256], strides = [1, 1]} : vector<10x256xf32> to vector<1x256xf32>
    %cst = arith.constant 0.00999999977 : f32
    %15 = vector.broadcast %cst : f32 to vector<1x256xf32>
    %16 = arith.addf %14, %15 : vector<1x256xf32>
    %17 = vector.extract_strided_slice %4 {offsets = [5, 0], sizes = [1, 256], strides = [1, 1]} : vector<10x256xf32> to vector<1x256xf32>
    %18 = vector.extract_strided_slice %4 {offsets = [6, 0], sizes = [1, 256], strides = [1, 1]} : vector<10x256xf32> to vector<1x256xf32>
    %19 = vector.extract_strided_slice %4 {offsets = [7, 0], sizes = [1, 256], strides = [1, 1]} : vector<10x256xf32> to vector<1x256xf32>
    %c0_5 = arith.constant 0 : index
    %c0_6 = arith.constant 0 : index
    %c0_7 = arith.constant 0 : index
    %20 = vector.load %arg4[%c0_5, %c0_6, %c0_7] : memref<1x1x256xf32, #tpu.memory_space<vmem>>, vector<1x1x256xf32>
    %21 = vector.shape_cast %20 : vector<1x1x256xf32> to vector<1x256xf32>
    %22 = arith.subf %7, %21 : vector<1x256xf32>
    %c0_8 = arith.constant 0 : index
    %c0_9 = arith.constant 0 : index
    %23 = vector.load %arg10[%c0_8, %c0_9] : memref<1x1xf32, #tpu.memory_space<vmem>>, vector<1x1xf32>
    %24 = vector.shape_cast %6 : vector<1x256xf32> to vector<1x1x256xf32>
    %cst_10 = arith.constant dense<0.000000e+00> : vector<1xf32>
    %25 = vector.multi_reduction <add>, %24, %cst_10 [1, 2] : vector<1x1x256xf32> to vector<1xf32>
    %26 = vector.shape_cast %25 : vector<1xf32> to vector<1x1x1xf32>
    %27 = vector.extract %26[0, 0, 0] : f32 from vector<1x1x1xf32>
    %28 = vector.broadcast %27 : f32 to vector<1x1xf32>
    %29 = arith.addf %23, %28 : vector<1x1xf32>
    %c0_11 = arith.constant 0 : index
    %c0_12 = arith.constant 0 : index
    %30 = vector.load %arg10[%c0_11, %c0_12] : memref<1x1xf32, #tpu.memory_space<vmem>>, vector<1x1xf32>
    tpu.vector_store %arg10[%c0_11, %c0_12], %29 {strides = array<i32>} : memref<1x1xf32, #tpu.memory_space<vmem>>, vector<1x1xf32>,
    %c0_13 = arith.constant 0 : index
    %c0_14 = arith.constant 0 : index
    %31 = vector.load %arg11[%c0_13, %c0_14] : memref<1x1xf32, #tpu.memory_space<vmem>>, vector<1x1xf32>
    %32 = arith.mulf %6, %6 : vector<1x256xf32>
    %33 = arith.subf %6, %32 : vector<1x256xf32>
    %34 = vector.shape_cast %33 : vector<1x256xf32> to vector<1x1x256xf32>
    %cst_15 = arith.constant dense<0.000000e+00> : vector<1xf32>
    %35 = vector.multi_reduction <add>, %34, %cst_15 [1, 2] : vector<1x1x256xf32> to vector<1xf32>
    %36 = vector.shape_cast %35 : vector<1xf32> to vector<1x1x1xf32>
    %37 = vector.extract %36[0, 0, 0] : f32 from vector<1x1x1xf32>
    %38 = vector.broadcast %37 : f32 to vector<1x1xf32>
    %39 = arith.addf %31, %38 : vector<1x1xf32>
    %c0_16 = arith.constant 0 : index
    %c0_17 = arith.constant 0 : index
    %40 = vector.load %arg11[%c0_16, %c0_17] : memref<1x1xf32, #tpu.memory_space<vmem>>, vector<1x1xf32>
    tpu.vector_store %arg11[%c0_16, %c0_17], %39 {strides = array<i32>} : memref<1x1xf32, #tpu.memory_space<vmem>>, vector<1x1xf32>,
    %c0_18 = arith.constant 0 : index
    %c0_19 = arith.constant 0 : index
    %41 = vector.load %arg12[%c0_18, %c0_19] : memref<1x1xf32, #tpu.memory_space<vmem>>, vector<1x1xf32>
    %42 = arith.mulf %22, %22 : vector<1x256xf32>
    %43 = vector.shape_cast %42 : vector<1x256xf32> to vector<1x1x256xf32>
    %cst_20 = arith.constant dense<0.000000e+00> : vector<1xf32>
    %44 = vector.multi_reduction <add>, %43, %cst_20 [1, 2] : vector<1x1x256xf32> to vector<1xf32>
    %45 = vector.shape_cast %44 : vector<1xf32> to vector<1x1x1xf32>
    %46 = vector.extract %45[0, 0, 0] : f32 from vector<1x1x1xf32>
    %47 = vector.broadcast %46 : f32 to vector<1x1xf32>
    %48 = arith.addf %41, %47 : vector<1x1xf32>
    %c0_21 = arith.constant 0 : index
    %c0_22 = arith.constant 0 : index
    %49 = vector.load %arg12[%c0_21, %c0_22] : memref<1x1xf32, #tpu.memory_space<vmem>>, vector<1x1xf32>
    tpu.vector_store %arg12[%c0_21, %c0_22], %48 {strides = array<i32>} : memref<1x1xf32, #tpu.memory_space<vmem>>, vector<1x1xf32>,
    %cst_23 = arith.constant 0.707106769 : f32
    %50 = vector.broadcast %cst_23 : f32 to vector<1x256xf32>
    %51 = arith.divf %50, %17 : vector<1x256xf32>
    %cst_24 = arith.constant 0.707106769 : f32
    %52 = vector.broadcast %cst_24 : f32 to vector<1x256xf32>
    %53 = arith.divf %52, %18 : vector<1x256xf32>
    %cst_25 = arith.constant 0.707106769 : f32
    %54 = vector.broadcast %cst_25 : f32 to vector<1x256xf32>
    %55 = arith.divf %54, %19 : vector<1x256xf32>
    %cst_26 = arith.constant 9.99999991E-38 : f32
    %56 = vector.broadcast %cst_26 : f32 to vector<1x256xf32>
    %57 = arith.maximumf %6, %56 : vector<1x256xf32>
    %58 = math.log %57 : vector<1x256xf32>
    %59 = math.log %17 : vector<1x256xf32>
    %60 = math.log %18 : vector<1x256xf32>
    %61 = arith.addf %59, %60 : vector<1x256xf32>
    %62 = math.log %19 : vector<1x256xf32>
    %63 = arith.addf %61, %62 : vector<1x256xf32>
    %64 = arith.subf %58, %63 : vector<1x256xf32>
    %cst_27 = arith.constant 2.75681567 : f32
    %65 = vector.broadcast %cst_27 : f32 to vector<1x256xf32>
    %66 = arith.subf %64, %65 : vector<1x256xf32>
    %c0_28 = arith.constant 0 : index
    %c0_29 = arith.constant 0 : index
    %c0_30 = arith.constant 0 : index
    %67 = vector.load %arg5[%c0_28, %c0_29, %c0_30] : memref<1x8x3xf32, #tpu.memory_space<vmem>>, vector<1x8x3xf32>
    %68 = vector.shape_cast %67 : vector<1x8x3xf32> to vector<8x3xf32>
    %69 = vector.extract_strided_slice %68 {offsets = [0, 0], sizes = [8, 1], strides = [1, 1]} : vector<8x3xf32> to vector<8x1xf32>
    %70 = vector.broadcast %69 : vector<8x1xf32> to vector<8x256xf32>
    %71 = vector.broadcast %10 : vector<1x256xf32> to vector<8x256xf32>
    %72 = arith.subf %70, %71 : vector<8x256xf32>
    %73 = vector.broadcast %51 : vector<1x256xf32> to vector<8x256xf32>
    %74 = arith.mulf %72, %73 : vector<8x256xf32>
    %75 = vector.extract_strided_slice %68 {offsets = [0, 1], sizes = [8, 1], strides = [1, 1]} : vector<8x3xf32> to vector<8x1xf32>
    %76 = vector.broadcast %75 : vector<8x1xf32> to vector<8x256xf32>
    %77 = vector.broadcast %13 : vector<1x256xf32> to vector<8x256xf32>
    %78 = arith.subf %76, %77 : vector<8x256xf32>
    %79 = vector.broadcast %53 : vector<1x256xf32> to vector<8x256xf32>
    %80 = arith.mulf %78, %79 : vector<8x256xf32>
    %81 = vector.extract_strided_slice %68 {offsets = [0, 2], sizes = [8, 1], strides = [1, 1]} : vector<8x3xf32> to vector<8x1xf32>
    %82 = vector.broadcast %81 : vector<8x1xf32> to vector<8x256xf32>
    %83 = vector.broadcast %16 : vector<1x256xf32> to vector<8x256xf32>
    %84 = arith.subf %82, %83 : vector<8x256xf32>
    %85 = vector.broadcast %55 : vector<1x256xf32> to vector<8x256xf32>
    %86 = arith.mulf %84, %85 : vector<8x256xf32>
    %87 = arith.mulf %74, %74 : vector<8x256xf32>
    %88 = vector.broadcast %66 : vector<1x256xf32> to vector<8x256xf32>
    %89 = arith.subf %88, %87 : vector<8x256xf32>
    %90 = arith.mulf %80, %80 : vector<8x256xf32>
    %91 = arith.subf %89, %90 : vector<8x256xf32>
    %92 = arith.mulf %86, %86 : vector<8x256xf32>
    %93 = arith.subf %91, %92 : vector<8x256xf32>
    %cst_31 = arith.constant dense<0xFF800000> : vector<8xf32>
    %94 = vector.multi_reduction <maximumf>, %93, %cst_31 [1] : vector<8x256xf32> to vector<8xf32>
    %95 = vector.shape_cast %94 : vector<8xf32> to vector<8x1xf32>
    %c0_32 = arith.constant 0 : index
    %c0_33 = arith.constant 0 : index
    %96 = vector.load %arg8[%c0_32, %c0_33] : memref<8x1xf32, #tpu.memory_space<vmem>>, vector<8x1xf32>
    %97 = arith.maximumf %96, %95 : vector<8x1xf32>
    %c0_34 = arith.constant 0 : index
    %c0_35 = arith.constant 0 : index
    %98 = vector.load %arg8[%c0_34, %c0_35] : memref<8x1xf32, #tpu.memory_space<vmem>>, vector<8x1xf32>
    %99 = arith.subf %98, %97 : vector<8x1xf32>
    %100 = math.exp %99 : vector<8x1xf32>
    %c0_36 = arith.constant 0 : index
    %c0_37 = arith.constant 0 : index
    %101 = vector.load %arg9[%c0_36, %c0_37] : memref<8x1xf32, #tpu.memory_space<vmem>>, vector<8x1xf32>
    %102 = arith.mulf %100, %101 : vector<8x1xf32>
    %103 = vector.broadcast %97 : vector<8x1xf32> to vector<8x256xf32>
    %104 = arith.subf %93, %103 : vector<8x256xf32>
    %105 = math.exp %104 : vector<8x256xf32>
    %cst_38 = arith.constant dense<0.000000e+00> : vector<8xf32>
    %106 = vector.multi_reduction <add>, %105, %cst_38 [1] : vector<8x256xf32> to vector<8xf32>
    %107 = vector.shape_cast %106 : vector<8xf32> to vector<8x1xf32>
    %108 = arith.addf %102, %107 : vector<8x1xf32>
    %c0_39 = arith.constant 0 : index
    %c0_40 = arith.constant 0 : index
    %109 = vector.load %arg9[%c0_39, %c0_40] : memref<8x1xf32, #tpu.memory_space<vmem>>, vector<8x1xf32>
    tpu.vector_store %arg9[%c0_39, %c0_40], %108 {strides = array<i32>} : memref<8x1xf32, #tpu.memory_space<vmem>>, vector<8x1xf32>,
    %c0_41 = arith.constant 0 : index
    %c0_42 = arith.constant 0 : index
    %110 = vector.load %arg8[%c0_41, %c0_42] : memref<8x1xf32, #tpu.memory_space<vmem>>, vector<8x1xf32>
    tpu.vector_store %arg8[%c0_41, %c0_42], %97 {strides = array<i32>} : memref<8x1xf32, #tpu.memory_space<vmem>>, vector<8x1xf32>,
    %c0_i32_43 = arith.constant 0 : i32
    %111 = arith.cmpi eq, %arg1, %c0_i32_43 : i32
    %112 = arith.extui %111 : i1 to i32
    %c0_i32_44 = arith.constant 0 : i32
    %113 = arith.cmpi ne, %112, %c0_i32_44 : i32
    scf.if %113 {
      %c0_45 = arith.constant 0 : index
      %c0_46 = arith.constant 0 : index
      %114 = vector.load %arg10[%c0_45, %c0_46] : memref<1x1xf32, #tpu.memory_space<vmem>>, vector<1x1xf32>
      %c0_47 = arith.constant 0 : index
      %c0_48 = arith.constant 0 : index
      %115 = vector.load %arg8[%c0_47, %c0_48] : memref<8x1xf32, #tpu.memory_space<vmem>>, vector<8x1xf32>
      %c0_49 = arith.constant 0 : index
      %c0_50 = arith.constant 0 : index
      %116 = vector.load %arg9[%c0_49, %c0_50] : memref<8x1xf32, #tpu.memory_space<vmem>>, vector<8x1xf32>
      %117 = math.log %116 : vector<8x1xf32>
      %118 = arith.addf %115, %117 : vector<8x1xf32>
      %119 = math.log %114 : vector<1x1xf32>
      %120 = vector.broadcast %119 : vector<1x1xf32> to vector<8x1xf32>
      %121 = arith.subf %118, %120 : vector<8x1xf32>
      %cst_51 = arith.constant 0.000000e+00 : f32
      %122 = vector.broadcast %cst_51 : f32 to vector<8x1xf32>
      %123 = arith.subf %122, %121 : vector<8x1xf32>
      %c0_52 = arith.constant 0 : index
      %c0_53 = arith.constant 0 : index
      %c0_54 = arith.constant 0 : index
      %124 = vector.load %arg6[%c0_52, %c0_53, %c0_54] : memref<1x8x1xf32, #tpu.memory_space<vmem>>, vector<1x8x1xf32>
      %125 = vector.shape_cast %124 : vector<1x8x1xf32> to vector<8x1xf32>
      %126 = arith.mulf %123, %125 : vector<8x1xf32>
      %127 = vector.shape_cast %126 : vector<8x1xf32> to vector<1x8x1xf32>
      %cst_55 = arith.constant dense<0.000000e+00> : vector<1xf32>
      %128 = vector.multi_reduction <add>, %127, %cst_55 [1, 2] : vector<1x8x1xf32> to vector<1xf32>
      %129 = vector.shape_cast %128 : vector<1xf32> to vector<1x1x1xf32>
      %130 = vector.extract %129[0, 0, 0] : f32 from vector<1x1x1xf32>
      %131 = vector.broadcast %130 : f32 to vector<1x1xf32>
      %c0_56 = arith.constant 0 : index
      %c0_57 = arith.constant 0 : index
      %132 = vector.load %arg11[%c0_56, %c0_57] : memref<1x1xf32, #tpu.memory_space<vmem>>, vector<1x1xf32>
      %c0_58 = arith.constant 0 : index
      %c0_59 = arith.constant 0 : index
      %133 = vector.load %arg12[%c0_58, %c0_59] : memref<1x1xf32, #tpu.memory_space<vmem>>, vector<1x1xf32>
      %134 = tpu.concatenate %131, %114, %132, %133 in 1 : vector<1x1xf32>, vector<1x1xf32>, vector<1x1xf32>, vector<1x1xf32> -> vector<1x4xf32>
      %c0_60 = arith.constant 0 : index
      %c0_61 = arith.constant 0 : index
      %c0_62 = arith.constant 0 : index
      %135 = vector.load %arg7[%c0_60, %c0_61, %c0_62] : memref<1x1x4xf32, #tpu.memory_space<vmem>>, vector<1x1x4xf32>
      %136 = vector.shape_cast %135 : vector<1x1x4xf32> to vector<1x4xf32>
      %137 = vector.shape_cast %134 : vector<1x4xf32> to vector<1x1x4xf32>
      tpu.vector_store %arg7[%c0_60, %c0_61, %c0_62], %137 {strides = array<i32>} : memref<1x1x4xf32, #tpu.memory_space<vmem>>, vector<1x1x4xf32>,
    } else {
    }
    return
  }
  func.func @transform_0(%arg0: i32, %arg1: i32) -> (i32, i32, i32) {
    %c0_i32 = arith.constant 0 : i32
    %c0_i32_0 = arith.constant 0 : i32
    return %arg0, %c0_i32, %arg1 : i32, i32, i32
  }
  func.func @transform_1(%arg0: i32, %arg1: i32) -> (i32, i32) {
    %c0_i32 = arith.constant 0 : i32
    %c0_i32_0 = arith.constant 0 : i32
    return %c0_i32, %arg1 : i32, i32
  }
  func.func @transform_2(%arg0: i32, %arg1: i32) -> (i32, i32, i32) {
    %c0_i32 = arith.constant 0 : i32
    %c0_i32_0 = arith.constant 0 : i32
    return %arg0, %c0_i32, %arg1 : i32, i32, i32
  }
  func.func @transform_3(%arg0: i32, %arg1: i32) -> (i32, i32, i32) {
    %c0_i32 = arith.constant 0 : i32
    %c0_i32_0 = arith.constant 0 : i32
    %c0_i32_1 = arith.constant 0 : i32
    return %arg0, %c0_i32, %c0_i32_0 : i32, i32, i32
  }
  func.func @transform_4(%arg0: i32, %arg1: i32) -> (i32, i32, i32) {
    %c0_i32 = arith.constant 0 : i32
    %c0_i32_0 = arith.constant 0 : i32
    %c0_i32_1 = arith.constant 0 : i32
    return %arg0, %c0_i32, %c0_i32_0 : i32, i32, i32
  }
  func.func @transform_5(%arg0: i32, %arg1: i32) -> (i32, i32, i32) {
    %c0_i32 = arith.constant 0 : i32
    %c0_i32_0 = arith.constant 0 : i32
    %c0_i32_1 = arith.constant 0 : i32
    return %arg0, %c0_i32, %c0_i32_0 : i32, i32, i32
  }
}

</mosaic_0001>

<bundles_post_ra>
// kernel: tpu_custom_call.1
= control target key start
LH: loop header
LB: loop body
LE: loop exit
PB: predicated region body
PF: predicated region fallthrough
CT: control target
= control target key end

     0   :  { %10 = vsyncpa [#allocation8], 0  ;;  %s1194_s0 = inlined_call_operand.vmem [shape: f32[2,10,256], index: 0, kind: input, shape index: {}]   ;;  %s1195_s1 = inlined_call_operand.vmem [shape: f32[2,256], index: 1, kind: input, shape index: {}]   ;;  %s1196_s2 = inlined_call_operand.vmem [shape: f32[2,1,256], index: 2, kind: input, shape index: {}]   ;;  %s1197_s3 = inlined_call_operand.vmem [shape: f32[2,8,3], index: 3, kind: input, shape index: {}]   ;;  %s1198_s4 = inlined_call_operand.vmem [shape: f32[2,8,1], index: 4, kind: input, shape index: {}]   ;;  %s1199_s5 = inlined_call_operand.hbm [shape: f32[2,1,4], index: 5, kind: output, shape index: {}]  }
   0x1   :  { %12 = vsyncpa [#allocation8 + $0x1], 0  ;;  %s1008_s18 = smov 0   ;;  %s1010_s19 = smov 0  }
   0x2   :  { %s1012_s20 = smov 0   ;;  %s1014_s21 = smov 0  }
   0x3   :  { %s1016_s22 = smov 0   ;;  %s1018_s23 = smov 0  }
   0x4 LB: > { %s773_s24 = sadd.s32 4294967295, %s968_s23   ;;  %s774_s25 = sadd.s32 4294967294, %s968_s23   ;;  %s968_s23 = sphi %s1018_s23, %s18_s23   ;;  %s964_s22 = sphi %s1016_s22, %s1210_s22   ;;  %s960_s21 = sphi %s1014_s21, %s1209_s21   ;;  %s956_s20 = sphi %s1012_s20, %s1208_s20   ;;  %s952_s19 = sphi %s1010_s19, %s1207_s19   ;;  %s948_s18 = sphi %s1008_s18, %s1206_s18  }
   0x5   : > { %s30_s26 = sadd.s32 1, %s964_s22  ;;  %s171_s27 = sadd.s32 1, %s956_s20 }
   0x6   : > { %p32_p0 = scmp.ge.s32.totalorder %s30_s26, 2  ;;  %p181_p1 = scmp.ne.s32.totalorder %s956_s20, %s952_s19 }
   0x7   : > { %p182_p2 = scmp.eq.s32.totalorder %s773_s24, 1  ;;  %p187_p3 = scmp.ne.s32.totalorder %s952_s19, %s948_s18 }
   0x8   : > { %s1212_s26 = smov (%p32_p0, %s30_s26), 0  ;;  %p188_p5 = scmp.eq.s32.totalorder %s774_s25, 1 }
   0x9   : > { %p1048_p4 = por %p182_p2, %p181_p1  ;;  %s168_s29 = ssub.s32 %s964_s22, %s1212_s26 }
   0xa   : > { %p778_p6 = scmp.ge.s32.totalorder %s968_s23, 1  ;;  %p169_p7 = scmp.eq.s32.totalorder %s168_s29, 0 }
   0xb   : > { %p1055_p8 = por %p188_p5, %p187_p3  ;;  %p254_p9 = scmp.lt.s32.totalorder %s968_s23, 3 }
   0xc   : > { %s1061_s6 = scalar_select %p169_p7, %s956_s20, %s171_s27  }
   0xd   : > { %p255_p10 = pnand %p778_p6, %p254_p9 }
   0xe   : > { %p307_p11 = scmp.lt.s32.totalorder (!%p255_p10), %s960_s21, 1  ;;  %s975_s10 = smov (!%p255_p10), 1  }
   0xf   : > { %258 = sbr.rel (%p255_p10) target bundleno = 713 (0x2c9), region = 40  ;;  %s304_s16 = sand.u32 (!%p255_p10), 1, %s952_s19  }
  0x10   : > { %s646_s25 = scalar_lea.hbm (!%p255_p10), %s1199_s5, %s960_s21  ;;  %s305_s27 = scalar_lea.vmem (!%p255_p10), [#allocation7], %s304_s16 }
  0x14   : > { %v970_v0 = vmov 0   ;;  %v971_v1 = vmov 2   ;;  %s1065_s7 = scalar_select %p307_p11, %s960_s21, 1  ;;  %v972_v3 = vmov 1   ;;  %v354_v25 = vld [vmem:[%s1195_s1] sm:$0xf] }
  0x15   : > { %860 = vset.pattern.permute.xlu0 %v970_v0  ;;  %862 = vset.pattern.permute.xlu1 %v971_v1  ;;  %v356_v36 = vperm.slane %v354_v25, 0  ;;  %v357_v37 = vperm.slane %v354_v25, 2  ;;  %vm379_vm7 = vcmask 1040384   ;;  %vm343_vm8 = vcmask 7168   ;;  %s638_s21 = scalar_lea.sflag [#allocation8], %s304_s16 }
  0x16   : > { %863 = vset.pattern.permute.xlu2 %v970_v0  ;;  %s782_s8 = sshll.u32 %s1065_s7, 3  ;;  %s788_s12 = sshll.u32 %s1065_s7, 5  ;;  %v973_v43 = vmov -1e+30   ;;  %v362_v63 = vperm.slane %v354_v25, 1  ;;  %vm346_vm10 = vcmask 0  }
  0x17   : > { %s334_s11 = scalar_lea.vmem %s1197_s3, %s782_s8  ;;  %s1077_s15 = scalar_lea.vmem %s1194_s0, %s788_s12  ;;  %344 = vst.msk [vmem:[#allocation2] sm:$0xff] %vm343_vm8, %v973_v43  ;;  %vm631_vm11 = vcmask 15360   ;;  %vm633_vm12 = vcmask 23552   ;;  %vm635_vm13 = vcmask 24576  }
  0x18   : > { %v504_v2 = vld [vmem:[%s334_s11] sm:$0xff]  ;;  %v1083_v5 = vld [vmem:[%s1077_s15 + $0x8] sm:$0xff]  ;;  %s781_s24 = sshll.u32 %s1065_s7, 1  ;;  %s338_s13 = scalar_lea.vmem %s1198_s4, %s782_s8 }
  0x19   : > { %507 = vperm.xlu0 %860, %v504_v2   ;;  %531 = vperm.xlu1 %862, %v504_v2   ;;  %v1080_v4 = vld [vmem:[%s1077_s15] sm:$0xff]  ;;  %v471_v18 = vmax.f32 %v1083_v5, 1e-37  ;;  %vm460_vm2 = vweird.f32 %v1083_v5  ;;  %v466_v27 = vand.u32 2147483648, %v1083_v5  ;;  %v464_v30 = vand.u32 2147483647, %v1083_v5  ;;  %s329_s29 = scalar_lea.vmem %s1196_s2, %s781_s24 }
  0x1a   : > { %868 = vrcp.f32 %v1080_v4  ;;  %v470_v17 = vmax.f32 %v1080_v4, 1e-37  ;;  %vm445_vm0 = vweird.f32 %v1080_v4  ;;  %v451_v19 = vand.u32 2147483648, %v1080_v4  ;;  %s976_s7 = smov 2  }
  0x1b   : > { %870 = vrcp.f32 %v1083_v5  ;;  %v449_v24 = vand.u32 2147483647, %v1080_v4  ;;  %v467_v39 = vor.u32 1.1754944e-38, %v466_v27  ;;  %vm465_vm9 = vcmp.eq.f32.partialorder %v464_v30, 8.507059e+37 }
  0x1c   : > { %872 = vlog2.f32 %v1080_v4  ;;  %v452_v28 = vor.u32 1.1754944e-38, %v451_v19  ;;  %v380_v41 = vsel %vm379_vm7, %v1080_v4, 0.0  ;;  %v381_v42 = vsel %vm379_vm7, %v1083_v5, 0.0 }
  0x1d   : > { %874 = vlog2.f32 %v1083_v5  ;;  %vm450_vm6 = vcmp.eq.f32.partialorder %v449_v24, 8.507059e+37  ;;  %v382_v48 = vadd.f32 %v381_v42, %v380_v41  ;;  %v360_v50 = vadd.f32 %v356_v36, %v1080_v4 }
  0x1e   : > { %876 = vlog2.f32 %v470_v17  ;;  %v361_v51 = vadd.f32 %v357_v37, %v1083_v5  ;;  %v368_v59 = vadd.f32 0.01, %v1080_v4  ;;  %v369_v60 = vadd.f32 0.01, %v1083_v5 }
  0x1f   : > { %878 = vlog2.f32 %v471_v18  ;;  %383 = vadd.xlane.f32.xlu2 %v382_v48  ;;  %v510_v61 = vperm.slane %v360_v50, 2  ;;  %v974_v50 = vmov 0.0  }
  0x20   : > { %v869_v6 = vpop.eup %868  ;;  %v511_v62 = vperm.slane %v361_v51, 2  ;;  %345 = vst.msk [vmem:[#allocation3] sm:$0xff] %vm343_vm8, %v974_v50 }
  0x21   : > { %861 = vset.pattern.permute.xlu0 %v972_v3  ;;  %v871_v7 = vpop.eup %870  ;;  %v441_v8 = vmul.f32 %v869_v6, %v1080_v4  ;;  %vm446_vm1 = vweird.f32 %v869_v6  ;;  %347 = vst.msk [vmem:[#allocation4] sm:$0x1] %vm346_vm10, %v974_v50 }
  0x22   : > { %519 = vperm.xlu0 %861, %v504_v2   ;;  %v456_v9 = vmul.f32 %v871_v7, %v1083_v5  ;;  %v873_v10 = vpop.eup %872  ;;  %vm461_vm3 = vweird.f32 %v871_v7  ;;  %vm1100_vm4 = vmor %vm445_vm0, %vm446_vm1  ;;  %348 = vst.msk [vmem:[#allocation5] sm:$0x1] %vm346_vm10, %v974_v50 }
  0x23   : > { %v875_v11 = vpop.eup %874  ;;  %v442_v12 = vsub.f32 1.0, %v441_v8  ;;  %v477_v14 = vmul.f32 0.6931472, %v873_v10  ;;  %vm1106_vm5 = vmor %vm460_vm2, %vm461_vm3  ;;  %v534_v8 = vperm.slane %v368_v59, 4  ;;  %349 = vst.msk [vmem:[#allocation6] sm:$0x1] %vm346_vm10, %v974_v50 }
  0x24   : > { %v457_v13 = vsub.f32 1.0, %v456_v9  ;;  %v479_v15 = vmul.f32 0.6931472, %v875_v11  ;;  %v877_v44 = vpop.eup %876  ;;  %v535_v9 = vperm.slane %v369_v60, 4 }
  0x25   : > { %v443_v16 = vmul.f32 %v869_v6, %v442_v12  ;;  %v482_v21 = vrot.slane %v477_v14, 1  ;;  %v488_v34 = vrot.slane %v477_v14, 2  ;;  %v879_v49 = vpop.eup %878  ;;  %v473_v54 = vmul.f32 0.6931472, %v877_v44 }
  0x26   : > { %v458_v20 = vmul.f32 %v871_v7, %v457_v13  ;;  %v483_v22 = vrot.slane %v479_v15, 1  ;;  %v489_v35 = vrot.slane %v479_v15, 2  ;;  %v475_v55 = vmul.f32 0.6931472, %v879_v49 }
  0x27   : > { %v444_v23 = vadd.f32 %v869_v6, %v443_v16  ;;  %v486_v32 = vadd.f32 %v482_v21, %v477_v14  ;;  %v366_v12 = vadd.f32 %v362_v63, %v1080_v4  ;;  %v352_v63 = vld [vmem:[%s1077_s15 + $0x10] sm:$0x3] }
  0x28   : > { %v459_v29 = vadd.f32 %v871_v7, %v458_v20  ;;  %v487_v33 = vadd.f32 %v483_v22, %v479_v15 }
  0x29   : > { %v448_v38 = vsel %vm1100_vm4, %v869_v6, %v444_v23  ;;  %v492_v46 = vadd.f32 %v488_v34, %v486_v32  ;;  %v522_v23 = vperm.slane %v366_v12, 3 }
  0x2a   : > { %864 = vset.pattern.permute.xlu0 %v970_v0  ;;  %v463_v40 = vsel %vm1106_vm5, %v871_v7, %v459_v29  ;;  %v453_v45 = vsel %vm450_vm6, %v452_v28, %v448_v38  ;;  %v493_v47 = vadd.f32 %v489_v35, %v487_v33  ;;  %v363_v0 = vperm.slane %v354_v25, 3 }
  0x2b   : > { %v468_v52 = vsel %vm465_vm9, %v467_v39, %v463_v40  ;;  %v454_v53 = vmul.f32 0.70710677, %v453_v45  ;;  %v496_v56 = vrot.slane %v492_v46, 5 }
  0x2c   : > { %v497_v57 = vrot.slane %v493_v47, 5  ;;  %v469_v58 = vmul.f32 0.70710677, %v468_v52  ;;  %v367_v13 = vadd.f32 %v363_v0, %v1083_v5  ;;  %v353_v0 = vld [vmem:[%s1077_s15 + $0x18] sm:$0x3]  ;;  %s977_s15 = smov 3  }
  0x2d   : > { %v500_v2 = vsub.f32 %v473_v54, %v496_v56  ;;  %v514_v6 = vperm.slane %v454_v53, 5  ;;  %v538_v19 = vperm.slane %v454_v53, 7  ;;  %v526_v25 = vperm.slane %v454_v53, 6 }
  0x2e   : > { %v501_v3 = vsub.f32 %v475_v55, %v497_v57  ;;  %v515_v7 = vperm.slane %v469_v58, 5  ;;  %v539_v20 = vperm.slane %v469_v58, 7  ;;  %v523_v24 = vperm.slane %v367_v13, 3  ;;  %v559_v57 = vld [vmem:[#allocation2] sm:$0xff] }
  0x2f   : > { %v784_v15 = vadd.f32 -2.7568157, %v500_v2  ;;  %v527_v26 = vperm.slane %v469_v58, 6 }
  0x30   : > { %v785_v16 = vadd.f32 -2.7568157, %v501_v3 }
  0x31   : > { %v544_v27 = vperm.slane %v784_v15, 0 }
  0x32   : > { %v545_v28 = vperm.slane %v785_v16, 0 }
  0x8b   : > { %v508_v1 = vpop.permute.xlu0 %507  ;;  %v532_v14 = vpop.permute.xlu1 %531 }
  0x8c   : > { %v512_v10 = vsub.f32 %v508_v1, %v510_v61  ;;  %v513_v11 = vsub.f32 %v508_v1, %v511_v62  ;;  %v536_v17 = vsub.f32 %v532_v14, %v534_v8  ;;  %v537_v18 = vsub.f32 %v532_v14, %v535_v9  ;;  %v370_v1 = vld [vmem:[%s329_s29] sm:$0x3]  ;;  %s648_s29 = sshll.u32 %s305_s27, 4  ;;  %s649_s29 = int_to_ptr.vmem [resolvable:$true] %s648_s29 }
  0x8d   : > { %v397_v61 = vmul.f32 %v1080_v4, %v1080_v4  ;;  %v398_v62 = vmul.f32 %v1083_v5, %v1083_v5 }
  0x8e   : > { %v516_v21 = vmul.f32 %v514_v6, %v512_v10  ;;  %v517_v22 = vmul.f32 %v515_v7, %v513_v11  ;;  %v540_v30 = vmul.f32 %v538_v19, %v536_v17  ;;  %v541_v31 = vmul.f32 %v539_v20, %v537_v18 }
  0x8f   : > { %v399_v2 = vsub.f32 %v1080_v4, %v397_v61  ;;  %v400_v3 = vsub.f32 %v1083_v5, %v398_v62  ;;  %v372_v6 = vperm.slane %v370_v1, 0  ;;  %v373_v7 = vperm.slane %v370_v1, 1  ;;  %v378_v4 = vld [vmem:[#allocation4] sm:$0x1] }
  0x90   : > { %v542_v32 = vmul.f32 %v516_v21, %v516_v21  ;;  %v543_v33 = vmul.f32 %v517_v22, %v517_v22  ;;  %v552_v38 = vmul.f32 %v540_v30, %v540_v30  ;;  %v553_v39 = vmul.f32 %v541_v31, %v541_v31 }
  0x91   : > { %v401_v8 = vsel %vm379_vm7, %v399_v2, 0.0  ;;  %v402_v9 = vsel %vm379_vm7, %v400_v3, 0.0  ;;  %v376_v10 = vsub.f32 %v352_v63, %v372_v6  ;;  %v377_v11 = vsub.f32 %v353_v0, %v373_v7  ;;  %v396_v0 = vld [vmem:[#allocation5] sm:$0x1]  ;;  %v416_v6 = vld [vmem:[#allocation6] sm:$0x1] }
  0x92   : > { %v546_v40 = vsub.f32 %v544_v27, %v542_v32  ;;  %v547_v41 = vsub.f32 %v545_v28, %v543_v33  ;;  %v384_v49 = vpop.xlane.xlu2 %383  ;;  %v403_v12 = vadd.f32 %v402_v9, %v401_v8 }
  0x93   : > { %v385_v51 = vrot.slane %v384_v49, 4  ;;  %v417_v14 = vmul.f32 %v376_v10, %v376_v10  ;;  %v418_v15 = vmul.f32 %v377_v11, %v377_v11 }
  0x94   : > { %v520_v29 = vpop.permute.xlu0 %519 }
  0x95   : > { %v524_v34 = vsub.f32 %v520_v29, %v522_v23  ;;  %v525_v35 = vsub.f32 %v520_v29, %v523_v24  ;;  %v386_v52 = vadd.f32 %v385_v51, %v384_v49  ;;  %v421_v5 = vrot.slane %v417_v14, 1 }
  0x96   : > { %v422_v16 = vrot.slane %v418_v15, 1 }
  0x97   : > { %v528_v36 = vmul.f32 %v526_v25, %v524_v34  ;;  %v529_v37 = vmul.f32 %v527_v26, %v525_v35  ;;  %v387_v53 = vrot.slane %v386_v52, 2  ;;  %v425_v18 = vsel %vm379_vm7, %v421_v5, 0.0 }
  0x98   : > { %v426_v19 = vsel %vm379_vm7, %v422_v16, 0.0 }
  0x99   : > { %v548_v42 = vmul.f32 %v528_v36, %v528_v36  ;;  %v549_v43 = vmul.f32 %v529_v37, %v529_v37  ;;  %v388_v54 = vadd.f32 %v387_v53, %v386_v52  ;;  %v427_v20 = vadd.f32 %v426_v19, %v425_v18 }
  0x9b   : > { %v550_v44 = vsub.f32 %v546_v40, %v548_v42  ;;  %v551_v45 = vsub.f32 %v547_v41, %v549_v43  ;;  %v389_v55 = vrot.slane %v388_v54, 1 }
  0x9d   : > { %v554_v46 = vsub.f32 %v550_v44, %v552_v38  ;;  %v555_v47 = vsub.f32 %v551_v45, %v553_v39  ;;  %v390_v56 = vadd.f32 %v389_v55, %v388_v54  ;;  %v564_v39 = vld [vmem:[#allocation3] sm:$0xff] }
  0x9f   : > { %v556_v48 = vmax.f32 %v554_v46, %v555_v47  ;;  %789 = vpush %v390_v56 }
  0xa1   : > { %557 = vmax.xlane.f32.xlu1 %v556_v48 }
  0xa9   : > { %428 = vadd.xlane.f32.xlu1 %v427_v20 }
  0xd0   : > { %s790_s9 = spop %789 }
  0xd1   : > { %v392_v13 = vstv %s790_s9 }
  0xd2   : > { %v393_v17 = vadd.f32 %v392_v13, %v378_v4 }
  0xd4   : > { %395 = vst.msk [vmem:[#allocation4] sm:$0x1] %vm346_vm10, %v393_v17 }
  0xdb   : > { %v865_v29 = vld [vmem:[#allocation4] ss:$0 sm:$0xff] }
 0x114   : > { %v558_v58 = vpop.xlane.xlu1 %557 }
 0x115   : > { %v560_v59 = vmax.f32 %v559_v57, %v558_v58 }
 0x117   : > { %v561_v60 = vsub.f32 %v559_v57, %v560_v59  ;;  %583 = vst.msk [vmem:[#allocation2] sm:$0xff] %vm343_vm8, %v560_v59  ;;  %568 = vperm.xlu2 %863, %v560_v59  }
 0x119   : > { %v562_v36 = vmul.f32 1.442695, %v561_v60  ;;  %v600_v60 = vld [vmem:[%s338_s13] sm:$0xff] }
 0x11c   : > { %v429_v40 = vpop.xlane.xlu1 %428 }
 0x11d   : > { %v430_v41 = vrot.slane %v429_v40, 4 }
 0x11e   : > { %v588_v56 = vld [vmem:[#allocation2] sm:$0xff] }
 0x11f   : > { %v431_v44 = vadd.f32 %v430_v41, %v429_v40 }
 0x140   : > { %404 = vadd.xlane.f32.xlu2 %v403_v12 }
 0x171   : > { %v569_v21 = vpop.permute.xlu2 %568 }
 0x172   : > { %v571_v22 = vsub.f32 %v554_v46, %v569_v21  ;;  %v572_v23 = vsub.f32 %v555_v47, %v569_v21  ;;  %v432_v46 = vrot.slane %v431_v44, 2  ;;  %v587_v47 = vld [vmem:[#allocation4] sm:$0x1] }
 0x174   : > { %v573_v24 = vmul.f32 1.442695, %v571_v22  ;;  %v575_v25 = vmul.f32 1.442695, %v572_v23  ;;  %v433_v48 = vadd.f32 %v432_v46, %v431_v44 }
 0x176   : > { %880 = vpow2.f32 %v573_v24  ;;  %v434_v49 = vrot.slane %v433_v48, 1 }
 0x177   : > { %882 = vpow2.f32 %v575_v25 }
 0x178   : > { %884 = vpow2.f32 %v562_v36  ;;  %v435_v50 = vadd.f32 %v434_v49, %v433_v48 }
 0x179   : > { %886 = vlog2.f32 %v587_v47 }
 0x17c   : > { %v881_v26 = vpop.eup %880 }
 0x17d   : > { %v883_v27 = vpop.eup %882 }
 0x17e   : > { %v577_v28 = vadd.f32 %v883_v27, %v881_v26  ;;  %v885_v38 = vpop.eup %884 }
 0x17f   : > { %v565_v42 = vmul.f32 %v885_v38, %v564_v39  ;;  %v887_v52 = vpop.eup %886 }
 0x180   : > { %578 = vadd.xlane.f32.xlu0 %v577_v28  ;;  %v594_v53 = vmul.f32 0.6931472, %v887_v52 }
 0x182   : > { %v596_v58 = vperm.slane %v594_v53, 0 }
 0x194   : > { %617 = vrot.lane.b32.xlu0 %v865_v29, %s975_s10  ;;  %s650_s10 = sshll.u32 %s646_s25, 4  ;;  %s651_s10 = int_to_ptr.hbm [resolvable:$true] %s650_s10 }
 0x195   : > { %s904_s11 = sshra.s32 %s651_s10, 4  ;;  %s905_s11 = int_to_ptr.hbm [resolvable:$true] %s904_s11 }
 0x196   : > { %s906_s12 = scalar_lea.hbm %s905_s11, 1  ;;  %p911_p1 = scmp.lt.s32.totalorder %s905_s11, %s1199_s5 }
 0x197   : > { %p907_p12 = scmp.ne.s32.totalorder %s905_s11, %s906_s12 }
 0x199   : > { %p908_p13 = pnand %p907_p12, %p1048_p4 }
 0x19b   : > { %p909_p0 = pneg %p908_p13 }
 0x1b3   : > { %v405_v30 = vpop.xlane.xlu2 %404 }
 0x1b4   : > { %v406_v31 = vrot.slane %v405_v30, 4 }
 0x1b6   : > { %v407_v32 = vadd.f32 %v406_v31, %v405_v30 }
 0x1b8   : > { %v408_v33 = vrot.slane %v407_v32, 2 }
 0x1ba   : > { %v409_v34 = vadd.f32 %v408_v33, %v407_v32 }
 0x1bc   : > { %v410_v35 = vrot.slane %v409_v34, 1 }
 0x1be   : > { %v411_v37 = vadd.f32 %v410_v35, %v409_v34 }
 0x1c0   : > { %791 = vpush %v411_v37 }
 0x1c1   : > { %793 = vpush %v435_v50 }
 0x1f1   : > { %s792_s14 = spop %791 }
 0x1f2   : > { %v413_v1 = vstv %s792_s14  ;;  %s794_s8 = spop %793 }
 0x1f3   : > { %v579_v43 = vpop.xlane.xlu0 %578  ;;  %v414_v2 = vadd.f32 %v413_v1, %v396_v0  ;;  %v437_v7 = vstv %s794_s8 }
 0x1f4   : > { %v580_v45 = vadd.f32 %v579_v43, %v565_v42  ;;  %v438_v8 = vadd.f32 %v437_v7, %v416_v6 }
 0x1f5   : > { %415 = vst.msk [vmem:[#allocation5] sm:$0x1] %vm346_vm10, %v414_v2 }
 0x1f6   : > { %582 = vst.msk [vmem:[#allocation3] sm:$0xff] %vm343_vm8, %v580_v45 }
 0x1f7   : > { %439 = vst.msk [vmem:[#allocation6] sm:$0x1] %vm346_vm10, %v438_v8 }
 0x1fc   : > { %v866_v3 = vld [vmem:[#allocation5] ss:$0 sm:$0xff] }
 0x1fd   : > { %v589_v51 = vld [vmem:[#allocation3] sm:$0xff] }
 0x1fe   : > { %888 = vlog2.f32 %v589_v51  ;;  %v867_v9 = vld [vmem:[#allocation6] ss:$0 sm:$0xff] }
 0x1ff   : > { %627 = vrot.lane.b32.xlu2 %v867_v9, %s977_s15 }
 0x204   : > { %v889_v54 = vpop.eup %888 }
 0x205   : > { %v591_v55 = vmul.f32 0.6931472, %v889_v54 }
 0x206   : > { %v618_v5 = vpop.permute.xlu0 %617 }
 0x207   : > { %v592_v57 = vadd.f32 %v591_v55, %v588_v56 }
 0x209   : > { %v598_v59 = vsub.f32 %v592_v57, %v596_v58 }
 0x20b   : > { %v599_v61 = vsub.f32 0.0, %v598_v59 }
 0x20d   : > { %v601_v62 = vmul.f32 %v600_v60, %v599_v61 }
 0x20f   : > { %v602_v63 = vsel %vm343_vm8, %v601_v62, 0.0 }
 0x210   : > { %603 = vadd.xlane.f32.xlu1 %v602_v63 }
 0x229   : > { %622 = vrot.lane.b32.xlu1 %v866_v3, %s976_s7  ;;  %s910_s7 = scalar_lea.hbm %s1199_s5, 2 }
 0x22a   : > { %p912_p2 = scmp.lt.s32.totalorder %s910_s7, %s906_s12 }
 0x22c   : > { %p913_p3 = por %p912_p2, %p911_p1 }
 0x22e   : > { %p914_p5 = pnand %p913_p3, %p909_p0 }
 0x259   : > { %v628_v19 = vpop.permute.xlu2 %627 }
 0x283   : > { %v604_v10 = vpop.xlane.xlu1 %603 }
 0x284   : > { %v605_v11 = vrot.slane %v604_v10, 4 }
 0x286   : > { %v606_v12 = vadd.f32 %v605_v11, %v604_v10 }
 0x288   : > { %v607_v13 = vrot.slane %v606_v12, 2 }
 0x28a   : > { %v608_v14 = vadd.f32 %v607_v13, %v606_v12 }
 0x28c   : > { %v609_v15 = vrot.slane %v608_v14, 1 }
 0x28e   : > { %v610_v4 = vadd.f32 %v609_v15, %v608_v14 }
 0x290   : > { %795 = vpush %v610_v4 }
 0x29b   : > { %v623_v17 = vpop.permute.xlu1 %622 }
 0x2c1   : > { %s796_s9 = spop %795 }
 0x2c2   : > { %v612_v16 = vstv %s796_s9 }
 0x2c3   : > { %v630_v18 = vsel %vm343_vm8, %v612_v16, %v618_v5 }
 0x2c4   : > { %v632_v20 = vsel %vm631_vm11, %v630_v18, %v623_v17 }
 0x2c5   : > { %v634_v21 = vsel %vm633_vm12, %v632_v20, %v628_v19 }
 0x2c6   : > { %636 = vst.msk [vmem:[%s305_s27] sm:$0x1] %vm635_vm13, %v634_v21 }
 0x2c7   : > { %917 = shalt.err (!%p914_p5)
}
 0x2c8   : > { %797 = dma.vmem_to_hbm [thread:$0]  (%p1048_p4), %s649_s29, 16, %s651_s10, %s638_s21  }
 0x2c9 PF: > { %p803_p6 = scmp.ge.s32.totalorder %s968_s23, 2  ;;  %s662_s16 = sand.u32 1, %s948_s18  }
 0x2ca   : > { %s663_s17 = scalar_lea.sflag [#allocation8], %s662_s16 }
 0x2cb   : > { %p800_p7 = pnand %p803_p6, %p1055_p8 }
 0x2cd   : > { %p801_p9 = pneg %p800_p7 }
 0x2cf   : > { %943 = dma.done.wait (%p801_p9), %s663_s17, 16  }
 0x2d0   : > { %945 = vsyncadd (%p801_p9), %s663_s17, 4294967280  ;;  %s18_s23 = sadd.s32 1, %s968_s23   ;;  %s1206_s18 = smov %s952_s19 }
 0x2d1   : > { %p15_p10 = scmp.ge.s32.totalorder %s18_s23, 4   ;;  %s1207_s19 = smov %s956_s20 }
 0x2d2   : > { %s1208_s20 = smov %s1061_s6  ;;  %s1209_s21 = smov %s964_s22 }
 0x2d3   : > { %s1210_s22 = smov %s1212_s26  ;;  %17 = sbr.rel (!%p15_p10) target bundleno = 4 (0x4), region = 95 }
 0x2d8   :  { %668 = vsyncpa [#allocation8], 1 }
 0x2d9   :  { %670 = vsyncpa [#allocation8 + $0x1], 1 }

</bundles_post_ra>
